<compile_context>
chip_gen: v6e
topology: v6e:2x2x1
jax: 0.10.0
libtpu: 0.0.40
codegen_flags: <defaults>
</compile_context>

<pallas_src>
import jax
import jax.numpy as jnp
from jax.experimental import pallas as pl
from jax.experimental.pallas import tpu as pltpu


def _round_up(x, m):
    return ((x + m - 1) // m) * m


_ACTIVATIONS = {
    "tanh": jnp.tanh,
    "relu": jax.nn.relu,
    "gelu": jax.nn.gelu,
    "sigmoid": jax.nn.sigmoid,
    "silu": jax.nn.silu,
    "linear": lambda x: x,
    "none": lambda x: x,
    None: lambda x: x,
}


def _choose_tile_b(B, widths, io_itemsize):
    """Largest batch tile that amortizes per-grid-step overhead and fits a
    conservative, lane-padding-aware VMEM budget."""
    in_pad = _round_up(widths[0], 128)
    out_pad = _round_up(widths[-1], 128)
    max_pad = max(_round_up(w, 128) for w in widths)
    # streamed input/output blocks are double-buffered by the BlockSpec pipeline
    stream_bytes_per_row = 2 * (in_pad + out_pad) * io_itemsize
    # in-kernel f32 working slabs (activations materialize in VMEM at this size)
    work_bytes_per_row = 3 * max_pad * 4
    vmem_budget = 24 * 1024 * 1024          # headroom under the 32 MiB scoped limit
    cap = max(8, vmem_budget // (stream_bytes_per_row + work_bytes_per_row))

    sub = 8 * max(1, 4 // io_itemsize)      # sublane alignment: 8 (f32) / 16 (bf16)
    tile_b = int(min(cap, 8192, _round_up(B, sub)))
    tile_b = max(sub, (tile_b // sub) * sub)
    # prefer >= 2 grid blocks so megacore (v7x) can shard the parallel batch axis
    if B > 2 * sub and pl.cdiv(B, tile_b) < 2:
        tile_b = max(sub, _round_up(pl.cdiv(B, 2), sub))
    return tile_b


def _make_chain_kernel(layer_meta, n_params):
    """layer_meta: list of dicts with has_bias / has_idt / resnet_mode / act_fn."""

    def kernel(x_ref, *refs):
        param_refs = refs[:n_params]
        o_ref = refs[n_params]
        h = x_ref[...].astype(jnp.float32)          # upcast once after HBM load
        idx = 0
        for meta in layer_meta:
            w = param_refs[idx][...].astype(jnp.float32)
            idx += 1
            y = jnp.dot(h, w, preferred_element_type=jnp.float32)   # MXU, f32 accum
            if meta["has_bias"]:
                y = y + param_refs[idx][...].astype(jnp.float32)    # (1, num_out)
                idx += 1
            y = meta["act_fn"](y)
            if meta["has_idt"]:
                y = y * param_refs[idx][...].astype(jnp.float32)    # timestep gate
                idx += 1
            if meta["resnet_mode"] == 1:
                y = y + h
            elif meta["resnet_mode"] == 2:
                # single full-width add (and later store) instead of two
                # half-width masked stores
                y = y + jnp.concatenate([h, h], axis=-1)
            h = y
        o_ref[...] = h.astype(o_ref.dtype)          # downcast once before HBM store

    return kernel


def mlp_chain_forward(xx, layers, *, tile_b=None, io_dtype=None):
    """Fused forward of a chain of MLPLayers in a single pallas_call.

    layers: sequence of (matrix, bias|None, idt|None, resnet: bool, activation: str)
    Intermediate activations never touch HBM; all parameters stay VMEM-resident.
    """
    num_in0 = layers[0][0].shape[0]
    if xx.shape[-1] != num_in0:
        raise ValueError(f"last dim of xx ({xx.shape[-1]}) != num_in ({num_in0})")
    orig_shape = xx.shape
    ori_dtype = xx.dtype
    prec = layers[0][0].dtype
    io_dtype = jnp.dtype(prec if io_dtype is None else io_dtype)

    x2d = xx.reshape(-1, num_in0).astype(io_dtype)   # flatten leading dims
    B = x2d.shape[0]

    layer_meta, params, widths = [], [], [num_in0]
    for (matrix, bias, idt, resnet, act) in layers:
        nin, nout = matrix.shape
        if nin != widths[-1]:
            raise ValueError("layer widths do not chain")
        widths.append(nout)
        params.append(matrix.astype(prec))
        meta = {
            "has_bias": bias is not None,
            "has_idt": idt is not None,
            "act_fn": _ACTIVATIONS[act],
        }
        if bias is not None:
            params.append(bias.reshape(1, nout).astype(prec))
        if idt is not None:
            params.append(idt.reshape(1, nout).astype(prec))
        if resnet and nout == nin:
            meta["resnet_mode"] = 1
        elif resnet and nout == 2 * nin:
            meta["resnet_mode"] = 2
        else:
            meta["resnet_mode"] = 0       # resnet=True with mismatched widths: no add
        layer_meta.append(meta)
    num_out_last = widths[-1]

    if tile_b is None:
        tile_b = _choose_tile_b(B, widths, io_dtype.itemsize)

    # ragged batch: cdiv grid, Pallas masks the edge block (no jnp.pad copy)
    grid = (pl.cdiv(B, tile_b),)

    in_specs = [pl.BlockSpec((tile_b, num_in0), lambda i: (i, 0))]
    # constant block index -> parameters stay resident in VMEM across grid steps
    for p in params:
        in_specs.append(pl.BlockSpec(p.shape, lambda i: (0, 0)))

    kernel = _make_chain_kernel(layer_meta, len(params))

    out = pl.pallas_call(
        kernel,
        out_shape=jax.ShapeDtypeStruct((B, num_out_last), io_dtype),
        grid_spec=pltpu.PrefetchScalarGridSpec(
            num_scalar_prefetch=0,
            grid=grid,
            in_specs=in_specs,
            out_specs=pl.BlockSpec((tile_b, num_out_last), lambda i: (i, 0)),
        ),
        compiler_params=pltpu.CompilerParams(
            dimension_semantics=("parallel",),
            vmem_limit_bytes=32 * 1024 * 1024,   # v5e default is 16 MiB; raise it
        ),
    )(x2d, *params)

    return out.reshape(*orig_shape[:-1], num_out_last).astype(ori_dtype)


def mlp_layer_forward(xx, matrix, bias=None, idt=None, *, resnet=False,
                      activation="tanh", tile_b=None, io_dtype=None):
    """Single MLPLayer.forward (equivalent to the PyTorch module)."""
    return mlp_chain_forward(
        xx, [(matrix, bias, idt, resnet, activation)],
        tile_b=tile_b, io_dtype=io_dtype)


def init_mlp_layer_params(key, num_in, num_out, bavg=0.0, stddev=1.0,
                          dtype=jnp.float32):
    """Deterministic equivalent of MLPLayer._default_normal_init."""
    k_w, k_b, k_idt = jax.random.split(key, 3)
    matrix = (jax.random.normal(k_w, (num_in, num_out), dtype)
              * (stddev / jnp.sqrt(float(num_in + num_out))))
    bias = bavg + stddev * jax.random.normal(k_b, (num_out,), dtype)
    idt = 0.1 + 0.001 * jax.random.normal(k_idt, (num_out,), dtype)
    return matrix, bias, idt


def _ref_layer(xx, matrix, bias, idt, resnet, activation="tanh"):
    yy = xx @ matrix
    if bias is not None:
        yy = yy + bias
    yy = _ACTIVATIONS[activation](yy)
    if idt is not None:
        yy = yy * idt
    if resnet:
        if yy.shape[-1] == xx.shape[-1]:
            yy = yy + xx
        elif yy.shape[-1] == 2 * xx.shape[-1]:
            yy = yy + jnp.concatenate([xx, xx], axis=-1)
    return yy


def _ref_chain(xx, layers):
    h = xx
    for (m, b, i, r, a) in layers:
        h = _ref_layer(h, m, b, i, r, a)
    return h


if __name__ == "__main__":
    key = jax.random.PRNGKey(0)
    k_x1, k_x2, k_p0, k_p1, k_p2 = jax.random.split(key, 5)

    num_in, num_out = 32, 64
    m0, b0, i0 = init_mlp_layer_params(k_p0, num_in, num_out)

    # Case 1: single layer (bias + use_timestep + resnet, num_out == 2*num_in).
    xx1 = jax.random.normal(k_x1, (2, 8, num_in), jnp.float32)
    yy1 = jax.block_until_ready(
        mlp_layer_forward(xx1, m0, b0, i0, resnet=True, activation="tanh"))
    ref1 = _ref_layer(xx1, m0, b0, i0, True)
    assert yy1.shape == (2, 8, num_out)
    assert jnp.allclose(yy1, ref1, atol=1e-4, rtol=1e-4)

    # Case 2: ragged batch (B = 111) -> cdiv grid with a masked edge block, no pad.
    xx2 = jax.random.normal(k_x2, (3, 37, num_in), jnp.float32)
    yy2 = jax.block_until_ready(
        mlp_layer_forward(xx2, m0, b0, i0, resnet=True))
    ref2 = _ref_layer(xx2, m0, b0, i0, True)
    assert yy2.shape == (3, 37, num_out)
    assert jnp.allclose(yy2, ref2, atol=1e-4, rtol=1e-4)

    # Case 3: fused 3-layer chain (32->64 resnet-x2, 64->64 resnet, 64->128 resnet-x2)
    # in ONE pallas_call; intermediate activations never leave VMEM.
    m1, b1, i1 = init_mlp_layer_params(k_p1, num_out, num_out)
    m2, b2, i2 = init_mlp_layer_params(k_p2, num_out, 2 * num_out)
    chain = [(m0, b0, i0, True, "tanh"),
             (m1, b1, i1, True, "tanh"),
             (m2, b2, i2, True, "tanh")]
    yy3 = jax.block_until_ready(mlp_chain_forward(xx2, chain))
    ref3 = _ref_chain(xx2, chain)
    assert yy3.shape == (3, 37, 2 * num_out)
    assert jnp.allclose(yy3, ref3, atol=2e-4, rtol=2e-4)

    # Case 4: bf16 HBM I/O (compute stays f32 in-kernel) - looser tolerance.
    yy4 = jax.block_until_ready(
        mlp_layer_forward(xx1, m0, b0, i0, resnet=True, io_dtype=jnp.bfloat16))
    assert yy4.shape == (2, 8, num_out)
    assert yy4.dtype == xx1.dtype
    assert jnp.allclose(yy4, ref1, atol=5e-2, rtol=5e-2)

    print("KERNEL_OK")
</pallas_src>

<mosaic_0001>
module attributes {stable_mosaic.version = 11 : i64} {
  func.func @kernel(%arg0: i32, %arg1: memref<16x32xf32, #tpu.memory_space<vmem>>, %arg2: memref<32x64xf32, #tpu.memory_space<vmem>>, %arg3: memref<1x64xf32, #tpu.memory_space<vmem>>, %arg4: memref<1x64xf32, #tpu.memory_space<vmem>>, %arg5: memref<16x64xf32, #tpu.memory_space<vmem>>) attributes {dimension_semantics = [#tpu.dimension_semantics<parallel>], iteration_bounds = array<i64: 1>, scalar_prefetch = 0 : i64, scratch_operands = 0 : i64, tpu.core_type = #tpu.core_type<tc>, window_params = [{transform_indices = @transform_0, window_bounds = array<i64: 16, 32>}, {pipeline_mode = #tpu.pipeline_mode<synchronous>, transform_indices = @transform_1, window_bounds = array<i64: 32, 64>}, {pipeline_mode = #tpu.pipeline_mode<synchronous>, transform_indices = @transform_2, window_bounds = array<i64: 1, 64>}, {pipeline_mode = #tpu.pipeline_mode<synchronous>, transform_indices = @transform_3, window_bounds = array<i64: 1, 64>}, {transform_indices = @transform_4, window_bounds = array<i64: 16, 64>}]} {
    %c0 = arith.constant 0 : index
    %c0_0 = arith.constant 0 : index
    %0 = vector.load %arg1[%c0, %c0_0] : memref<16x32xf32, #tpu.memory_space<vmem>>, vector<16x32xf32>
    %c0_1 = arith.constant 0 : index
    %c0_2 = arith.constant 0 : index
    %1 = vector.load %arg2[%c0_1, %c0_2] : memref<32x64xf32, #tpu.memory_space<vmem>>, vector<32x64xf32>
    %cst = arith.constant dense<0.000000e+00> : vector<16x64xf32>
    %2 = tpu.matmul %0, %1, %cst {dimension_numbers = #tpu.dot_dimension_numbers<[1], [0], [0], [1], [0, 0, 1, 1], [], []>} : vector<16x32xf32>, vector<32x64xf32>, vector<16x64xf32> -> vector<16x64xf32>
    %c0_3 = arith.constant 0 : index
    %c0_4 = arith.constant 0 : index
    %3 = vector.load %arg3[%c0_3, %c0_4] : memref<1x64xf32, #tpu.memory_space<vmem>>, vector<1x64xf32>
    %4 = vector.broadcast %3 : vector<1x64xf32> to vector<16x64xf32>
    %5 = arith.addf %2, %4 : vector<16x64xf32>
    %6 = math.tanh %5 : vector<16x64xf32>
    %c0_5 = arith.constant 0 : index
    %c0_6 = arith.constant 0 : index
    %7 = vector.load %arg4[%c0_5, %c0_6] : memref<1x64xf32, #tpu.memory_space<vmem>>, vector<1x64xf32>
    %8 = vector.broadcast %7 : vector<1x64xf32> to vector<16x64xf32>
    %9 = arith.mulf %6, %8 : vector<16x64xf32>
    %10 = tpu.concatenate %0, %0 in 1 : vector<16x32xf32>, vector<16x32xf32> -> vector<16x64xf32>
    %11 = arith.addf %9, %10 : vector<16x64xf32>
    %c0_7 = arith.constant 0 : index
    %c0_8 = arith.constant 0 : index
    %12 = vector.load %arg5[%c0_7, %c0_8] : memref<16x64xf32, #tpu.memory_space<vmem>>, vector<16x64xf32>
    tpu.vector_store %arg5[%c0_7, %c0_8], %11 {strides = array<i32>} : memref<16x64xf32, #tpu.memory_space<vmem>>, vector<16x64xf32>,
    return
  }
  func.func @transform_0(%arg0: i32) -> (i32, i32) {
    %c0_i32 = arith.constant 0 : i32
    %c0_i32_0 = arith.constant 0 : i32
    return %arg0, %c0_i32 : i32, i32
  }
  func.func @transform_1(%arg0: i32) -> (i32, i32) {
    %c0_i32 = arith.constant 0 : i32
    %c0_i32_0 = arith.constant 0 : i32
    %c0_i32_1 = arith.constant 0 : i32
    return %c0_i32, %c0_i32_0 : i32, i32
  }
  func.func @transform_2(%arg0: i32) -> (i32, i32) {
    %c0_i32 = arith.constant 0 : i32
    %c0_i32_0 = arith.constant 0 : i32
    %c0_i32_1 = arith.constant 0 : i32
    return %c0_i32, %c0_i32_0 : i32, i32
  }
  func.func @transform_3(%arg0: i32) -> (i32, i32) {
    %c0_i32 = arith.constant 0 : i32
    %c0_i32_0 = arith.constant 0 : i32
    %c0_i32_1 = arith.constant 0 : i32
    return %c0_i32, %c0_i32_0 : i32, i32
  }
  func.func @transform_4(%arg0: i32) -> (i32, i32) {
    %c0_i32 = arith.constant 0 : i32
    %c0_i32_0 = arith.constant 0 : i32
    return %arg0, %c0_i32 : i32, i32
  }
}

</mosaic_0001>

<bundles_post_ra>
// kernel: tpu_custom_call.1
= control target key start
LH: loop header
LB: loop body
LE: loop exit
PB: predicated region body
PF: predicated region fallthrough
CT: control target
= control target key end

     0   :  { %9 = vsyncpa [#allocation3], 0  ;;  %s339_s0 = inlined_call_operand.hbm [shape: f32[16,32], index: 0, kind: input, shape index: {}]   ;;  %s340_s1 = inlined_call_operand.hbm [shape: f32[32,64], index: 1, kind: input, shape index: {}]   ;;  %s341_s2 = inlined_call_operand.vmem [shape: f32[1,64], index: 2, kind: input, shape index: {}]   ;;  %s342_s3 = inlined_call_operand.vmem [shape: f32[1,64], index: 3, kind: input, shape index: {}]   ;;  %s343_s4 = inlined_call_operand.hbm [shape: f32[16,64], index: 4, kind: output, shape index: {}]  }
   0x1   :  { %10 = vsyncpa [#allocation6], 0 }
   0x2   :  { %11 = vsyncpa [#allocation4], 0  ;;  %s280_s15 = smov [#allocation2]  }
   0x3   :  { %s17_s16 = sshll.u32 %s280_s15, 4  ;;  %s18_s16 = int_to_ptr.vmem [resolvable:$true] %s17_s16 }
   0x4   :  { %s222_s17 = scalar_lea.vmem %s18_s16, 256  ;;  %p227_p1 = scmp.lt.s32.totalorder %s18_s16, %s18_s16 }
   0x5   :  { %p223_p0 = scmp.ne.s32.totalorder %s18_s16, %s222_s17  ;;  %p228_p2 = scmp.lt.s32.totalorder %s222_s17, %s222_s17 }
   0x7   :  { %p229_p3 = por %p228_p2, %p227_p1 }
   0x9   :  { %p230_p4 = pnand %p229_p3, %p223_p0 }
   0xb   :  { %233 = shalt.err (!%p230_p4)
}
   0xc   :  { %s281_s18 = smov 128   ;;  %s282_s19 = smov 8  }
   0xd   :  { %23 = dma.hbm_to_vmem [thread:$0]  %s339_s0, 256, %s18_s16, [#allocation3], %s281_s18, %s281_s18, %s282_s19  }
   0xe   :  { %s283_s22 = smov [#allocation5]  }
   0xf   :  { %s29_s23 = sshll.u32 %s283_s22, 4  ;;  %s30_s23 = int_to_ptr.vmem [resolvable:$true] %s29_s23 }
  0x10   :  { %s242_s24 = scalar_lea.vmem %s30_s23, 512  ;;  %p247_p6 = scmp.lt.s32.totalorder %s30_s23, %s30_s23 }
  0x11   :  { %p243_p5 = scmp.ne.s32.totalorder %s30_s23, %s242_s24  ;;  %p248_p7 = scmp.lt.s32.totalorder %s242_s24, %s242_s24 }
  0x13   :  { %p249_p8 = por %p248_p7, %p247_p6 }
  0x15   :  { %p250_p9 = pnand %p249_p8, %p243_p5 }
  0x17   :  { %253 = shalt.err (!%p250_p9)
}
  0x18   :  { %35 = dma.hbm_to_vmem [thread:$0]  %s340_s1, 512, %s30_s23, [#allocation6], %s281_s18, %s281_s18, %s282_s19  }
  0x19   :  { %274 = dma.done.wait [#allocation3], 256  }
  0x1a   :  { %275 = vsyncadd [#allocation3], 4294967040 }
  0x1b   :  { %276 = dma.done.wait [#allocation6], 512  }
  0x1c   :  { %277 = vsyncadd [#allocation6], 4294966784  ;;  %vm59_vm0 = vcmask 261120   ;;  %v51_v0 = vld [vmem:[#allocation5 + $0x18] sm:$0xff]  ;;  %v50_v1 = vld [vmem:[#allocation5 + $0x10] sm:$0xff]  ;;  %s284_s0 = smov 32  }
  0x1d   :  { %193 = vmatprep.subr.mxu0 %v51_v0  ;;  %v46_v2 = vld [vmem:[#allocation2] sm:$0xff]  ;;  %v49_v3 = vld [vmem:[#allocation5 + $0x8] sm:$0xff]  ;;  %v48_v4 = vld [vmem:[#allocation5] sm:$0xff]  ;;  %vm162_vm1 = vcmask 523264   ;;  %s285_s30 = smov [#allocation7]  }
  0x1e   :  { %194 = vmatpush3.msra.mxu0 %v51_v0  ;;  %201 = vmatprep.mubr.msk.f32.mxu0 %vm59_vm0, %v46_v2  ;;  %v47_v5 = vld [vmem:[#allocation2 + $0x8] sm:$0xff]  ;;  %v183_v6 = vld [vmem:[%s341_s2] ss:$0 sm:$0xff]  ;;  %s170_s2 = sshll.u32 %s285_s30, 4  ;;  %s171_s2 = int_to_ptr.vmem [resolvable:$true] %s170_s2 }
  0x1f   :  { %195 = vmatprep.subr.mxu0 %v50_v1  ;;  %152 = vrot.lane.b32.xlu0 %v46_v2, %s284_s0  ;;  %v186_v13 = vld [vmem:[%s342_s3] ss:$0 sm:$0xff]  ;;  %s254_s5 = scalar_lea.vmem %s171_s2, 256  ;;  %p259_p11 = scmp.lt.s32.totalorder %s171_s2, %s171_s2 }
  0x20   :  { %196 = vmatpush3.msra.mxu0 %v50_v1  ;;  %p255_p10 = scmp.ne.s32.totalorder %s171_s2, %s254_s5  ;;  %p260_p12 = scmp.lt.s32.totalorder %s254_s5, %s254_s5 }
  0x21   :  { %197 = vmatprep.subr.mxu0 %v49_v3 }
  0x22   :  { %198 = vmatpush3.msra.mxu0 %v49_v3  ;;  %p261_p13 = por %p260_p12, %p259_p11 }
  0x23   :  { %199 = vmatprep.subr.mxu0 %v48_v4  ;;  %154 = vrot.lane.b32.xlu0 %v47_v5, %s284_s0 }
  0x24   :  { %200 = vmatpush3.msra.mxu0 %v48_v4  ;;  %p262_p0 = pnand %p261_p13, %p255_p10 }
  0x25   :  { %202 = vmatmul.mubr.msk.f32.vlgmr.msra.gmra.mxu0 %vm59_vm0, %v47_v5 }
  0x91   :  { %v153_v11 = vpop.permute.xlu0 %152 }
  0x92   :  { %v158_v20 = vsel %vm59_vm0, %v46_v2, %v153_v11 }
  0x95   :  { %v155_v12 = vpop.permute.xlu0 %154 }
  0x96   :  { %v159_v15 = vsel %vm59_vm0, %v47_v5, %v155_v12 }
  0xe5   :  { %v203_v7 = vpop.f32.mrf.mxu0 }
  0xe6   :  { %v138_v8 = vadd.f32 %v203_v7, %v183_v6 }
  0xe7   :  { %v132_v9 = vpop.f32.mrf.mxu0 }
  0xe8   :  { %210 = vtanh.f32 %v138_v8  ;;  %v133_v10 = vadd.f32 %v183_v6, %v132_v9 }
  0xea   :  { %212 = vtanh.f32 %v133_v10 }
  0xf5   :  { %v211_v14 = vpop.eup %210 }
  0xf6   :  { %v151_v16 = vmul.f32 %v211_v14, %v186_v13 }
  0xf7   :  { %v213_v17 = vpop.eup %212 }
  0xf8   :  { %v150_v18 = vmul.f32 %v213_v17, %v186_v13  ;;  %v161_v19 = vadd.f32 %v159_v15, %v151_v16 }
  0xfa   :  { %v160_v21 = vadd.f32 %v158_v20, %v150_v18  ;;  %164 = vst.msk [vmem:[#allocation7 + $0x8] sm:$0xff] %vm162_vm1, %v161_v19 }
  0xfc   :  { %163 = vst.msk [vmem:[#allocation7] sm:$0xff] %vm162_vm1, %v160_v21 }
  0xfd   :  { %265 = shalt.err (!%p262_p0)
}
  0xfe   :  { %176 = dma.vmem_to_hbm [thread:$0]  %s171_s2, 256, %s343_s4, [#allocation4], %s281_s18, %s281_s18, %s282_s19  }
  0xff   :  { %278 = dma.done.wait [#allocation4], 256  }
 0x100   :  { %279 = vsyncadd [#allocation4], 4294967040 }
 0x101   :  { %180 = vsyncpa [#allocation3], 1 }
 0x102   :  { %181 = vsyncpa [#allocation6], 1 }
 0x103   :  { %182 = vsyncpa [#allocation4], 1 }

</bundles_post_ra>
